<compile_context>
chip_gen: v7x
topology: tpu7x:2x2x1
jax: 0.10.0
libtpu: 0.0.40
codegen_flags: <defaults>
</compile_context>

<pallas_src>
import numpy as np
import jax
import jax.numpy as jnp
from jax.experimental import pallas as pl
from jax.experimental.pallas import tpu as pltpu


# ----------------------------- fused Pallas kernel ---------------------------

def _make_fused_kernel(taps1, offs2, offs3, l1, l2, l3):
    """taps1: per-conv1-tap (slab parity, row offset); offs2/offs3: per-tap row
    offsets for conv2/conv3 in shared j-space; l1/l2/l3: slab row counts."""

    def conv(y_bf, g_ref, brow_ref, offs, out_len):
        # y_bf: (rows, 128) bf16 slab.  One MXU matmul per H tap, f32
        # accumulate, f32 bias (folded BN) + ReLU.
        acc = None
        for kh, off in enumerate(offs):
            t = jnp.dot(y_bf[off:off + out_len, :], g_ref[kh],
                        preferred_element_type=jnp.float32)
            acc = t if acc is None else acc + t
        return jnp.maximum(acc + brow_ref[...], 0.0)

    def kernel(xe_ref, xo_ref, g1, bb1, g2, bb2, g3, bb3, pool, gfc, bfc, o_ref):
        slabs = (xe_ref, xo_ref)
        # conv1: H-stride-2 folded into the even/odd slabs -> contiguous loads.
        acc = None
        for kh, (par, off) in enumerate(taps1):
            a = slabs[par][pl.ds(off, l1), :]                  # (l1, 128) bf16
            t = jnp.dot(a, g1[kh], preferred_element_type=jnp.float32)
            acc = t if acc is None else acc + t
        y = jnp.maximum(acc + bb1[...], 0.0).astype(jnp.bfloat16)
        # conv2 / conv3: strides live in the static tap offsets.
        y = conv(y, g2, bb2, offs2, l2).astype(jnp.bfloat16)
        y = conv(y, g3, bb3, offs3, l3).astype(jnp.bfloat16)
        # spatial mean (H rows via 0/1 pool matmul, W folded into gfc) + 1x1 fc.
        feats = jnp.dot(pool[...], y, preferred_element_type=jnp.float32)
        out = jnp.dot(feats.astype(jnp.bfloat16), gfc[...],
                      preferred_element_type=jnp.float32) + bfc[...]
        o_ref[0] = out

    return kernel


# ----------------------------- wrapper ----------------------------------------

def _full_spec(a):
    nd = a.ndim
    return pl.BlockSpec(a.shape, lambda n, _nd=nd: (0,) * _nd)


def _choose_blocking(n, target=32):
    """(grid steps, images per step).  >=2 steps when N>1 so v7x can use both
    TensorCores via the 'parallel' grid axis; target ~32 images/step so each
    conv tap's matmul M is a few hundred rows."""
    steps = max(1, (n + target - 1) // target)
    if n > 1:
        steps = max(steps, 2)
    b_blk = (n + steps - 1) // steps
    return steps, b_blk


def cartpole_conv_forward(x_nchw, lowered):
    """x_nchw: (N, C, H, W) float input (PyTorch layout)."""
    N, C, H, W = x_nchw.shape
    lane0, h_pad = lowered["lane0"], lowered["h_pad"]
    half = h_pad // 2
    steps, b_blk = _choose_blocking(N)
    n_pad = steps * b_blk

    # NCHW -> per-image lane-dense (H, W*C) slabs, padded to (h_pad, lane0),
    # then de-interleaved into even/odd H-row slabs (folds conv1's H stride 2).
    x2d = jnp.transpose(x_nchw, (0, 2, 3, 1)).astype(jnp.float32).reshape(N, H, W * C)
    x2d = jnp.pad(x2d, ((0, n_pad - N), (0, h_pad - H), (0, lane0 - W * C)))
    xe = x2d[:, 0::2, :].reshape(n_pad * half, lane0).astype(jnp.bfloat16)
    xo = x2d[:, 1::2, :].reshape(n_pad * half, lane0).astype(jnp.bfloat16)

    taps1, offs2, offs3 = lowered["taps1"], lowered["offs2"], lowered["offs3"]
    l0 = b_blk * half
    l1 = l0 - max(off for _, off in taps1)
    l2 = l1 - max(offs2)
    l3 = l2 - max(offs3)

    # 0/1 pooling matrix: per image, sums its h_last valid conv3 output rows.
    h_last, spacing = lowered["h_last"], lowered["spacing"]
    pool = np.zeros((b_blk, l3), np.float32)
    for bi in range(b_blk):
        for hh in range(h_last):
            pool[bi, bi * half + spacing * hh] = 1.0
    pool = jnp.asarray(pool, jnp.bfloat16)

    (g1, bb1), (g2, bb2), (g3, bb3) = lowered["convs"]
    gfc, bfc, a_pad = lowered["gfc"], lowered["bfc"], lowered["a_pad"]

    kernel = _make_fused_kernel(taps1, offs2, offs3, l1, l2, l3)
    out = pl.pallas_call(
        kernel,
        out_shape=jax.ShapeDtypeStruct((steps, b_blk, a_pad), jnp.float32),
        grid=(steps,),
        in_specs=[
            pl.BlockSpec((b_blk * half, lane0), lambda n: (n, 0)),
            pl.BlockSpec((b_blk * half, lane0), lambda n: (n, 0)),
            _full_spec(g1), _full_spec(bb1),
            _full_spec(g2), _full_spec(bb2),
            _full_spec(g3), _full_spec(bb3),
            _full_spec(pool), _full_spec(gfc), _full_spec(bfc),
        ],
        out_specs=pl.BlockSpec((1, b_blk, a_pad), lambda n: (n, 0, 0)),
        compiler_params=pltpu.CompilerParams(
            dimension_semantics=("parallel",),
            vmem_limit_bytes=32 * 1024 * 1024),
    )(xe, xo, g1, bb1, g2, bb2, g3, bb3, pool, gfc, bfc)

    return out.reshape(n_pad, a_pad)[:N, :lowered["act_dim"]]


# ----------------------------- parameters -------------------------------------

def _fold_bn(w_oihw, b, gamma, beta, mean, var, eps=1e-5):
    """Fold eval-mode BatchNorm into conv weights; return HWIO weight + bias."""
    scale = gamma / jnp.sqrt(var + eps)
    w_eff = w_oihw * scale[:, None, None, None]
    b_eff = (b - mean) * scale + beta
    return jnp.transpose(w_eff, (2, 3, 1, 0)), b_eff        # (KH, KW, Cin, Cout)


def init_params(key, act_dim, in_ch=3):
    keys = jax.random.split(key, 20)

    def u(k, shape, scale):
        return jax.random.uniform(k, shape, jnp.float32, minval=-scale, maxval=scale)

    p = {}
    layer_defs = [(8, in_ch, 5), (16, 8, 5), (16, 16, 3)]
    ki = 0
    for li, (co, ci, ksz) in enumerate(layer_defs, start=1):
        fan = float(ci * ksz * ksz)
        s = 1.0 / jnp.sqrt(fan)
        w = u(keys[ki], (co, ci, ksz, ksz), s); ki += 1
        b = u(keys[ki], (co,), s); ki += 1
        gamma = 1.0 + 0.1 * u(keys[ki], (co,), 1.0); ki += 1
        beta = 0.1 * u(keys[ki], (co,), 1.0); ki += 1
        mean = 0.05 * u(keys[ki], (co,), 1.0); ki += 1
        var = 1.0 + 0.1 * jnp.abs(u(keys[ki], (co,), 1.0)); ki += 1
        w_f, b_f = _fold_bn(w, b, gamma, beta, mean, var)   # folded in f32
        p[f"w{li}"], p[f"b{li}"] = w_f, b_f

    s = 1.0 / jnp.sqrt(16.0)
    w_fc = u(keys[ki], (act_dim, 16, 1, 1), s); ki += 1
    b_fc = u(keys[ki], (act_dim,), s); ki += 1
    p["w_fc"] = jnp.transpose(w_fc[:, :, 0, 0], (1, 0))     # (16, act_dim)
    p["b_fc"] = b_fc
    return p


def prepare_lowered_params(params, in_hw, in_ch, act_dim, lane_q=128):
    """One-time host lowering: banded ("Toeplitz") lane-padded conv weight
    slabs (W-stride + Cin folded into the MXU), folded-BN bias rows, j-space
    tap offsets, and the lane-padded pooled fc head.  Weights are cast to
    bf16 AFTER BN folding in f32."""
    def rup(v, m):
        return ((v + m - 1) // m) * m

    hin, win, cin = in_hw[0], in_hw[1], in_ch
    layer_defs = (("w1", "b1", 2), ("w2", "b2", 2), ("w3", "b3", 1))
    convs, tap_cfgs = [], []
    spacing = None                        # row spacing of current activation in j-space
    for li, (wk, bk, stride) in enumerate(layer_defs):
        w = np.asarray(params[wk], np.float32)               # (KH, KW, Cin, Cout)
        b = np.asarray(params[bk], np.float32)
        kh_n, kw_n, ci, co = w.shape
        assert ci == cin
        ho = (hin - kh_n) // stride + 1
        wo = (win - kw_n) // stride + 1
        lane_in = rup(win * ci, lane_q)
        lane_out = rup(wo * co, lane_q)
        # G[kh, wi*Cin + c, wo*Cout + co] = w[kh, wi - stride*wo, c, co]
        g = np.zeros((kh_n, lane_in, lane_out), np.float32)
        for woi in range(wo):
            for kw in range(kw_n):
                wi = stride * woi + kw
                g[:, wi * ci:(wi + 1) * ci, woi * co:(woi + 1) * co] = w[:, kw]
        brow = np.zeros((1, lane_out), np.float32)
        brow[0, :wo * co] = np.tile(b, wo)
        convs.append((jnp.asarray(g, jnp.bfloat16), jnp.asarray(brow)))
        if li == 0:
            # conv1's H-stride-2 is absorbed by the even/odd input slabs:
            # tap kh reads slab (kh % 2) at contiguous row offset kh // 2.
            assert stride == 2, "layer-1 lowering assumes stride 2"
            tap_cfgs.append(tuple((kh % 2, kh // 2) for kh in range(kh_n)))
            spacing = 1
        else:
            tap_cfgs.append(tuple(spacing * kh for kh in range(kh_n)))
            spacing *= stride
        hin, win, cin = ho, wo, co

    h_last, w_last, c_last = hin, win, cin
    a_pad = rup(act_dim, lane_q)
    lane_last = rup(w_last * c_last, lane_q)
    w_fc = np.asarray(params["w_fc"], np.float32)            # (C_last, act_dim)
    b_fc = np.asarray(params["b_fc"], np.float32)
    gfc = np.zeros((lane_last, a_pad), np.float32)
    gfc[:w_last * c_last, :act_dim] = (np.tile(w_fc, (w_last, 1))
                                       / float(h_last * w_last))
    bfc = np.zeros((1, a_pad), np.float32)
    bfc[0, :act_dim] = b_fc

    return {
        "convs": convs,
        "taps1": tap_cfgs[0], "offs2": tap_cfgs[1], "offs3": tap_cfgs[2],
        "spacing": spacing, "h_last": h_last,
        "h_pad": rup(in_hw[0], 32), "lane0": rup(in_hw[1] * in_ch, lane_q),
        "gfc": jnp.asarray(gfc, jnp.bfloat16), "bfc": jnp.asarray(bfc),
        "a_pad": a_pad, "act_dim": act_dim,
    }


# ----------------------------- pure-JAX reference -----------------------------

def ref_forward(x_nchw, p):
    x = jnp.transpose(x_nchw, (0, 2, 3, 1)).astype(jnp.float32)
    for w, b, s in [(p["w1"], p["b1"], 2), (p["w2"], p["b2"], 2), (p["w3"], p["b3"], 1)]:
        x = jax.lax.conv_general_dilated(
            x, w, (s, s), "VALID", dimension_numbers=("NHWC", "HWIO", "NHWC"))
        x = jnp.maximum(x + b[None, None, None, :], 0.0)
    m = jnp.mean(x, axis=(1, 2))                             # (N, 16)
    return m @ p["w_fc"] + p["b_fc"][None, :]


# ----------------------------- main --------------------------------------------

if __name__ == "__main__":
    key = jax.random.PRNGKey(0)
    k_x, k_p, k_x2 = jax.random.split(key, 3)

    act_dim = 4
    N, C, H, W = 2, 3, 28, 28           # small shapes consistent with the module
    x = jax.random.normal(k_x, (N, C, H, W), jnp.float32)

    params = init_params(k_p, act_dim, in_ch=C)
    lowered = prepare_lowered_params(params, (H, W), C, act_dim)

    fwd = jax.jit(lambda xs: cartpole_conv_forward(xs, lowered))
    out = jax.block_until_ready(fwd(x))
    assert out.shape == (N, act_dim), out.shape
    ref = ref_forward(x, params)
    err = float(jnp.max(jnp.abs(out - ref)))
    # bf16 MXU operands vs f32 reference -> a few 1e-3 absolute error expected.
    assert err < 2e-2, f"mismatch vs reference: {err}"

    # Second run: exercises multi-image slabs, batch padding and 2 "parallel"
    # grid steps (the batched-M path).
    N2 = 13
    x2 = jax.random.normal(k_x2, (N2, C, H, W), jnp.float32)
    out2 = jax.block_until_ready(
        jax.jit(lambda xs: cartpole_conv_forward(xs, lowered))(x2))
    assert out2.shape == (N2, act_dim), out2.shape
    err2 = float(jnp.max(jnp.abs(out2 - ref_forward(x2, params))))
    assert err2 < 2e-2, f"mismatch vs reference (batched): {err2}"

    print("KERNEL_OK")
</pallas_src>

<mosaic_0001>
module attributes {stable_mosaic.version = 11 : i64} {
  func.func @kernel(%arg0: i32, %arg1: memref<16x128xbf16, #tpu.memory_space<vmem>>, %arg2: memref<16x128xbf16, #tpu.memory_space<vmem>>, %arg3: memref<5x128x128xbf16, #tpu.memory_space<vmem>>, %arg4: memref<1x128xf32, #tpu.memory_space<vmem>>, %arg5: memref<5x128x128xbf16, #tpu.memory_space<vmem>>, %arg6: memref<1x128xf32, #tpu.memory_space<vmem>>, %arg7: memref<3x128x128xbf16, #tpu.memory_space<vmem>>, %arg8: memref<1x128xf32, #tpu.memory_space<vmem>>, %arg9: memref<1x6xbf16, #tpu.memory_space<vmem>>, %arg10: memref<128x128xbf16, #tpu.memory_space<vmem>>, %arg11: memref<1x128xf32, #tpu.memory_space<vmem>>, %arg12: memref<1x1x128xf32, #tpu.memory_space<vmem>>) attributes {dimension_semantics = [#tpu.dimension_semantics<parallel>], iteration_bounds = array<i64: 2>, scalar_prefetch = 0 : i64, scratch_operands = 0 : i64, tpu.core_type = #tpu.core_type<tc>, window_params = [{transform_indices = @transform_0, window_bounds = array<i64: 16, 128>}, {transform_indices = @transform_1, window_bounds = array<i64: 16, 128>}, {pipeline_mode = #tpu.pipeline_mode<synchronous>, transform_indices = @transform_2, window_bounds = array<i64: 5, 128, 128>}, {pipeline_mode = #tpu.pipeline_mode<synchronous>, transform_indices = @transform_3, window_bounds = array<i64: 1, 128>}, {pipeline_mode = #tpu.pipeline_mode<synchronous>, transform_indices = @transform_4, window_bounds = array<i64: 5, 128, 128>}, {pipeline_mode = #tpu.pipeline_mode<synchronous>, transform_indices = @transform_5, window_bounds = array<i64: 1, 128>}, {pipeline_mode = #tpu.pipeline_mode<synchronous>, transform_indices = @transform_6, window_bounds = array<i64: 3, 128, 128>}, {pipeline_mode = #tpu.pipeline_mode<synchronous>, transform_indices = @transform_7, window_bounds = array<i64: 1, 128>}, {pipeline_mode = #tpu.pipeline_mode<synchronous>, transform_indices = @transform_8, window_bounds = array<i64: 1, 6>}, {pipeline_mode = #tpu.pipeline_mode<synchronous>, transform_indices = @transform_9, window_bounds = array<i64: 128, 128>}, {pipeline_mode = #tpu.pipeline_mode<synchronous>, transform_indices = @transform_10, window_bounds = array<i64: 1, 128>}, {transform_indices = @transform_11, window_bounds = array<i64: 1, 1, 128>}]} {
    %c0 = arith.constant 0 : index
    %c0_0 = arith.constant 0 : index
    %0 = vector.load %arg1[%c0, %c0_0] : memref<16x128xbf16, #tpu.memory_space<vmem>>, vector<14x128xbf16>
    %c0_1 = arith.constant 0 : index
    %c0_2 = arith.constant 0 : index
    %c0_3 = arith.constant 0 : index
    %1 = vector.load %arg3[%c0_1, %c0_2, %c0_3] : memref<5x128x128xbf16, #tpu.memory_space<vmem>>, vector<1x128x128xbf16>
    %2 = vector.shape_cast %1 : vector<1x128x128xbf16> to vector<128x128xbf16>
    %cst = arith.constant dense<0.000000e+00> : vector<14x128xf32>
    %3 = tpu.matmul %0, %2, %cst {dimension_numbers = #tpu.dot_dimension_numbers<[1], [0], [0], [1], [0, 0, 1, 1], [], []>} : vector<14x128xbf16>, vector<128x128xbf16>, vector<14x128xf32> -> vector<14x128xf32>
    %c0_4 = arith.constant 0 : index
    %c0_5 = arith.constant 0 : index
    %4 = vector.load %arg2[%c0_4, %c0_5] : memref<16x128xbf16, #tpu.memory_space<vmem>>, vector<14x128xbf16>
    %c1 = arith.constant 1 : index
    %c0_6 = arith.constant 0 : index
    %c0_7 = arith.constant 0 : index
    %5 = vector.load %arg3[%c1, %c0_6, %c0_7] : memref<5x128x128xbf16, #tpu.memory_space<vmem>>, vector<1x128x128xbf16>
    %6 = vector.shape_cast %5 : vector<1x128x128xbf16> to vector<128x128xbf16>
    %cst_8 = arith.constant dense<0.000000e+00> : vector<14x128xf32>
    %7 = tpu.matmul %4, %6, %cst_8 {dimension_numbers = #tpu.dot_dimension_numbers<[1], [0], [0], [1], [0, 0, 1, 1], [], []>} : vector<14x128xbf16>, vector<128x128xbf16>, vector<14x128xf32> -> vector<14x128xf32>
    %8 = arith.addf %3, %7 : vector<14x128xf32>
    %c1_9 = arith.constant 1 : index
    %c0_10 = arith.constant 0 : index
    %9 = vector.load %arg1[%c1_9, %c0_10] : memref<16x128xbf16, #tpu.memory_space<vmem>>, vector<14x128xbf16>
    %c2 = arith.constant 2 : index
    %c0_11 = arith.constant 0 : index
    %c0_12 = arith.constant 0 : index
    %10 = vector.load %arg3[%c2, %c0_11, %c0_12] : memref<5x128x128xbf16, #tpu.memory_space<vmem>>, vector<1x128x128xbf16>
    %11 = vector.shape_cast %10 : vector<1x128x128xbf16> to vector<128x128xbf16>
    %cst_13 = arith.constant dense<0.000000e+00> : vector<14x128xf32>
    %12 = tpu.matmul %9, %11, %cst_13 {dimension_numbers = #tpu.dot_dimension_numbers<[1], [0], [0], [1], [0, 0, 1, 1], [], []>} : vector<14x128xbf16>, vector<128x128xbf16>, vector<14x128xf32> -> vector<14x128xf32>
    %13 = arith.addf %8, %12 : vector<14x128xf32>
    %c1_14 = arith.constant 1 : index
    %c0_15 = arith.constant 0 : index
    %14 = vector.load %arg2[%c1_14, %c0_15] : memref<16x128xbf16, #tpu.memory_space<vmem>>, vector<14x128xbf16>
    %c3 = arith.constant 3 : index
    %c0_16 = arith.constant 0 : index
    %c0_17 = arith.constant 0 : index
    %15 = vector.load %arg3[%c3, %c0_16, %c0_17] : memref<5x128x128xbf16, #tpu.memory_space<vmem>>, vector<1x128x128xbf16>
    %16 = vector.shape_cast %15 : vector<1x128x128xbf16> to vector<128x128xbf16>
    %cst_18 = arith.constant dense<0.000000e+00> : vector<14x128xf32>
    %17 = tpu.matmul %14, %16, %cst_18 {dimension_numbers = #tpu.dot_dimension_numbers<[1], [0], [0], [1], [0, 0, 1, 1], [], []>} : vector<14x128xbf16>, vector<128x128xbf16>, vector<14x128xf32> -> vector<14x128xf32>
    %18 = arith.addf %13, %17 : vector<14x128xf32>
    %c2_19 = arith.constant 2 : index
    %c0_20 = arith.constant 0 : index
    %19 = vector.load %arg1[%c2_19, %c0_20] : memref<16x128xbf16, #tpu.memory_space<vmem>>, vector<14x128xbf16>
    %c4 = arith.constant 4 : index
    %c0_21 = arith.constant 0 : index
    %c0_22 = arith.constant 0 : index
    %20 = vector.load %arg3[%c4, %c0_21, %c0_22] : memref<5x128x128xbf16, #tpu.memory_space<vmem>>, vector<1x128x128xbf16>
    %21 = vector.shape_cast %20 : vector<1x128x128xbf16> to vector<128x128xbf16>
    %cst_23 = arith.constant dense<0.000000e+00> : vector<14x128xf32>
    %22 = tpu.matmul %19, %21, %cst_23 {dimension_numbers = #tpu.dot_dimension_numbers<[1], [0], [0], [1], [0, 0, 1, 1], [], []>} : vector<14x128xbf16>, vector<128x128xbf16>, vector<14x128xf32> -> vector<14x128xf32>
    %23 = arith.addf %18, %22 : vector<14x128xf32>
    %c0_24 = arith.constant 0 : index
    %c0_25 = arith.constant 0 : index
    %24 = vector.load %arg4[%c0_24, %c0_25] : memref<1x128xf32, #tpu.memory_space<vmem>>, vector<1x128xf32>
    %25 = vector.broadcast %24 : vector<1x128xf32> to vector<14x128xf32>
    %26 = arith.addf %23, %25 : vector<14x128xf32>
    %cst_26 = arith.constant 0.000000e+00 : f32
    %27 = vector.broadcast %cst_26 : f32 to vector<14x128xf32>
    %28 = arith.maximumf %26, %27 : vector<14x128xf32>
    %29 = arith.truncf %28 : vector<14x128xf32> to vector<14x128xbf16>
    %30 = vector.extract_strided_slice %29 {offsets = [0, 0], sizes = [10, 128], strides = [1, 1]} : vector<14x128xbf16> to vector<10x128xbf16>
    %c0_27 = arith.constant 0 : index
    %c0_28 = arith.constant 0 : index
    %c0_29 = arith.constant 0 : index
    %31 = vector.load %arg5[%c0_27, %c0_28, %c0_29] : memref<5x128x128xbf16, #tpu.memory_space<vmem>>, vector<1x128x128xbf16>
    %32 = vector.shape_cast %31 : vector<1x128x128xbf16> to vector<128x128xbf16>
    %cst_30 = arith.constant dense<0.000000e+00> : vector<10x128xf32>
    %33 = tpu.matmul %30, %32, %cst_30 {dimension_numbers = #tpu.dot_dimension_numbers<[1], [0], [0], [1], [0, 0, 1, 1], [], []>} : vector<10x128xbf16>, vector<128x128xbf16>, vector<10x128xf32> -> vector<10x128xf32>
    %34 = vector.extract_strided_slice %29 {offsets = [1, 0], sizes = [10, 128], strides = [1, 1]} : vector<14x128xbf16> to vector<10x128xbf16>
    %c1_31 = arith.constant 1 : index
    %c0_32 = arith.constant 0 : index
    %c0_33 = arith.constant 0 : index
    %35 = vector.load %arg5[%c1_31, %c0_32, %c0_33] : memref<5x128x128xbf16, #tpu.memory_space<vmem>>, vector<1x128x128xbf16>
    %36 = vector.shape_cast %35 : vector<1x128x128xbf16> to vector<128x128xbf16>
    %cst_34 = arith.constant dense<0.000000e+00> : vector<10x128xf32>
    %37 = tpu.matmul %34, %36, %cst_34 {dimension_numbers = #tpu.dot_dimension_numbers<[1], [0], [0], [1], [0, 0, 1, 1], [], []>} : vector<10x128xbf16>, vector<128x128xbf16>, vector<10x128xf32> -> vector<10x128xf32>
    %38 = arith.addf %33, %37 : vector<10x128xf32>
    %39 = vector.extract_strided_slice %29 {offsets = [2, 0], sizes = [10, 128], strides = [1, 1]} : vector<14x128xbf16> to vector<10x128xbf16>
    %c2_35 = arith.constant 2 : index
    %c0_36 = arith.constant 0 : index
    %c0_37 = arith.constant 0 : index
    %40 = vector.load %arg5[%c2_35, %c0_36, %c0_37] : memref<5x128x128xbf16, #tpu.memory_space<vmem>>, vector<1x128x128xbf16>
    %41 = vector.shape_cast %40 : vector<1x128x128xbf16> to vector<128x128xbf16>
    %cst_38 = arith.constant dense<0.000000e+00> : vector<10x128xf32>
    %42 = tpu.matmul %39, %41, %cst_38 {dimension_numbers = #tpu.dot_dimension_numbers<[1], [0], [0], [1], [0, 0, 1, 1], [], []>} : vector<10x128xbf16>, vector<128x128xbf16>, vector<10x128xf32> -> vector<10x128xf32>
    %43 = arith.addf %38, %42 : vector<10x128xf32>
    %44 = vector.extract_strided_slice %29 {offsets = [3, 0], sizes = [10, 128], strides = [1, 1]} : vector<14x128xbf16> to vector<10x128xbf16>
    %c3_39 = arith.constant 3 : index
    %c0_40 = arith.constant 0 : index
    %c0_41 = arith.constant 0 : index
    %45 = vector.load %arg5[%c3_39, %c0_40, %c0_41] : memref<5x128x128xbf16, #tpu.memory_space<vmem>>, vector<1x128x128xbf16>
    %46 = vector.shape_cast %45 : vector<1x128x128xbf16> to vector<128x128xbf16>
    %cst_42 = arith.constant dense<0.000000e+00> : vector<10x128xf32>
    %47 = tpu.matmul %44, %46, %cst_42 {dimension_numbers = #tpu.dot_dimension_numbers<[1], [0], [0], [1], [0, 0, 1, 1], [], []>} : vector<10x128xbf16>, vector<128x128xbf16>, vector<10x128xf32> -> vector<10x128xf32>
    %48 = arith.addf %43, %47 : vector<10x128xf32>
    %49 = vector.extract_strided_slice %29 {offsets = [4, 0], sizes = [10, 128], strides = [1, 1]} : vector<14x128xbf16> to vector<10x128xbf16>
    %c4_43 = arith.constant 4 : index
    %c0_44 = arith.constant 0 : index
    %c0_45 = arith.constant 0 : index
    %50 = vector.load %arg5[%c4_43, %c0_44, %c0_45] : memref<5x128x128xbf16, #tpu.memory_space<vmem>>, vector<1x128x128xbf16>
    %51 = vector.shape_cast %50 : vector<1x128x128xbf16> to vector<128x128xbf16>
    %cst_46 = arith.constant dense<0.000000e+00> : vector<10x128xf32>
    %52 = tpu.matmul %49, %51, %cst_46 {dimension_numbers = #tpu.dot_dimension_numbers<[1], [0], [0], [1], [0, 0, 1, 1], [], []>} : vector<10x128xbf16>, vector<128x128xbf16>, vector<10x128xf32> -> vector<10x128xf32>
    %53 = arith.addf %48, %52 : vector<10x128xf32>
    %c0_47 = arith.constant 0 : index
    %c0_48 = arith.constant 0 : index
    %54 = vector.load %arg6[%c0_47, %c0_48] : memref<1x128xf32, #tpu.memory_space<vmem>>, vector<1x128xf32>
    %55 = vector.broadcast %54 : vector<1x128xf32> to vector<10x128xf32>
    %56 = arith.addf %53, %55 : vector<10x128xf32>
    %cst_49 = arith.constant 0.000000e+00 : f32
    %57 = vector.broadcast %cst_49 : f32 to vector<10x128xf32>
    %58 = arith.maximumf %56, %57 : vector<10x128xf32>
    %59 = arith.truncf %58 : vector<10x128xf32> to vector<10x128xbf16>
    %60 = vector.extract_strided_slice %59 {offsets = [0, 0], sizes = [6, 128], strides = [1, 1]} : vector<10x128xbf16> to vector<6x128xbf16>
    %c0_50 = arith.constant 0 : index
    %c0_51 = arith.constant 0 : index
    %c0_52 = arith.constant 0 : index
    %61 = vector.load %arg7[%c0_50, %c0_51, %c0_52] : memref<3x128x128xbf16, #tpu.memory_space<vmem>>, vector<1x128x128xbf16>
    %62 = vector.shape_cast %61 : vector<1x128x128xbf16> to vector<128x128xbf16>
    %cst_53 = arith.constant dense<0.000000e+00> : vector<6x128xf32>
    %63 = tpu.matmul %60, %62, %cst_53 {dimension_numbers = #tpu.dot_dimension_numbers<[1], [0], [0], [1], [0, 0, 1, 1], [], []>} : vector<6x128xbf16>, vector<128x128xbf16>, vector<6x128xf32> -> vector<6x128xf32>
    %64 = vector.extract_strided_slice %59 {offsets = [2, 0], sizes = [6, 128], strides = [1, 1]} : vector<10x128xbf16> to vector<6x128xbf16>
    %c1_54 = arith.constant 1 : index
    %c0_55 = arith.constant 0 : index
    %c0_56 = arith.constant 0 : index
    %65 = vector.load %arg7[%c1_54, %c0_55, %c0_56] : memref<3x128x128xbf16, #tpu.memory_space<vmem>>, vector<1x128x128xbf16>
    %66 = vector.shape_cast %65 : vector<1x128x128xbf16> to vector<128x128xbf16>
    %cst_57 = arith.constant dense<0.000000e+00> : vector<6x128xf32>
    %67 = tpu.matmul %64, %66, %cst_57 {dimension_numbers = #tpu.dot_dimension_numbers<[1], [0], [0], [1], [0, 0, 1, 1], [], []>} : vector<6x128xbf16>, vector<128x128xbf16>, vector<6x128xf32> -> vector<6x128xf32>
    %68 = arith.addf %63, %67 : vector<6x128xf32>
    %69 = vector.extract_strided_slice %59 {offsets = [4, 0], sizes = [6, 128], strides = [1, 1]} : vector<10x128xbf16> to vector<6x128xbf16>
    %c2_58 = arith.constant 2 : index
    %c0_59 = arith.constant 0 : index
    %c0_60 = arith.constant 0 : index
    %70 = vector.load %arg7[%c2_58, %c0_59, %c0_60] : memref<3x128x128xbf16, #tpu.memory_space<vmem>>, vector<1x128x128xbf16>
    %71 = vector.shape_cast %70 : vector<1x128x128xbf16> to vector<128x128xbf16>
    %cst_61 = arith.constant dense<0.000000e+00> : vector<6x128xf32>
    %72 = tpu.matmul %69, %71, %cst_61 {dimension_numbers = #tpu.dot_dimension_numbers<[1], [0], [0], [1], [0, 0, 1, 1], [], []>} : vector<6x128xbf16>, vector<128x128xbf16>, vector<6x128xf32> -> vector<6x128xf32>
    %73 = arith.addf %68, %72 : vector<6x128xf32>
    %c0_62 = arith.constant 0 : index
    %c0_63 = arith.constant 0 : index
    %74 = vector.load %arg8[%c0_62, %c0_63] : memref<1x128xf32, #tpu.memory_space<vmem>>, vector<1x128xf32>
    %75 = vector.broadcast %74 : vector<1x128xf32> to vector<6x128xf32>
    %76 = arith.addf %73, %75 : vector<6x128xf32>
    %cst_64 = arith.constant 0.000000e+00 : f32
    %77 = vector.broadcast %cst_64 : f32 to vector<6x128xf32>
    %78 = arith.maximumf %76, %77 : vector<6x128xf32>
    %79 = arith.truncf %78 : vector<6x128xf32> to vector<6x128xbf16>
    %c0_65 = arith.constant 0 : index
    %c0_66 = arith.constant 0 : index
    %80 = vector.load %arg9[%c0_65, %c0_66] : memref<1x6xbf16, #tpu.memory_space<vmem>>, vector<1x6xbf16>
    %cst_67 = arith.constant dense<0.000000e+00> : vector<1x128xf32>
    %81 = tpu.matmul %80, %79, %cst_67 {dimension_numbers = #tpu.dot_dimension_numbers<[1], [0], [0], [1], [0, 0, 1, 1], [], []>} : vector<1x6xbf16>, vector<6x128xbf16>, vector<1x128xf32> -> vector<1x128xf32>
    %82 = arith.truncf %81 : vector<1x128xf32> to vector<1x128xbf16>
    %c0_68 = arith.constant 0 : index
    %c0_69 = arith.constant 0 : index
    %83 = vector.load %arg10[%c0_68, %c0_69] : memref<128x128xbf16, #tpu.memory_space<vmem>>, vector<128x128xbf16>
    %cst_70 = arith.constant dense<0.000000e+00> : vector<1x128xf32>
    %84 = tpu.matmul %82, %83, %cst_70 {dimension_numbers = #tpu.dot_dimension_numbers<[1], [0], [0], [1], [0, 0, 1, 1], [], []>} : vector<1x128xbf16>, vector<128x128xbf16>, vector<1x128xf32> -> vector<1x128xf32>
    %c0_71 = arith.constant 0 : index
    %c0_72 = arith.constant 0 : index
    %85 = vector.load %arg11[%c0_71, %c0_72] : memref<1x128xf32, #tpu.memory_space<vmem>>, vector<1x128xf32>
    %86 = arith.addf %84, %85 : vector<1x128xf32>
    %c0_73 = arith.constant 0 : index
    %c0_74 = arith.constant 0 : index
    %c0_75 = arith.constant 0 : index
    %87 = vector.load %arg12[%c0_73, %c0_74, %c0_75] : memref<1x1x128xf32, #tpu.memory_space<vmem>>, vector<1x1x128xf32>
    %88 = vector.shape_cast %87 : vector<1x1x128xf32> to vector<1x128xf32>
    %89 = vector.shape_cast %86 : vector<1x128xf32> to vector<1x1x128xf32>
    tpu.vector_store %arg12[%c0_73, %c0_74, %c0_75], %89 {strides = array<i32>} : memref<1x1x128xf32, #tpu.memory_space<vmem>>, vector<1x1x128xf32>,
    return
  }
  func.func @transform_0(%arg0: i32) -> (i32, i32) {
    %c0_i32 = arith.constant 0 : i32
    %c0_i32_0 = arith.constant 0 : i32
    return %arg0, %c0_i32 : i32, i32
  }
  func.func @transform_1(%arg0: i32) -> (i32, i32) {
    %c0_i32 = arith.constant 0 : i32
    %c0_i32_0 = arith.constant 0 : i32
    return %arg0, %c0_i32 : i32, i32
  }
  func.func @transform_2(%arg0: i32) -> (i32, i32, i32) {
    %c0_i32 = arith.constant 0 : i32
    %c0_i32_0 = arith.constant 0 : i32
    %c0_i32_1 = arith.constant 0 : i32
    %c0_i32_2 = arith.constant 0 : i32
    return %c0_i32, %c0_i32_0, %c0_i32_1 : i32, i32, i32
  }
  func.func @transform_3(%arg0: i32) -> (i32, i32) {
    %c0_i32 = arith.constant 0 : i32
    %c0_i32_0 = arith.constant 0 : i32
    %c0_i32_1 = arith.constant 0 : i32
    return %c0_i32, %c0_i32_0 : i32, i32
  }
  func.func @transform_4(%arg0: i32) -> (i32, i32, i32) {
    %c0_i32 = arith.constant 0 : i32
    %c0_i32_0 = arith.constant 0 : i32
    %c0_i32_1 = arith.constant 0 : i32
    %c0_i32_2 = arith.constant 0 : i32
    return %c0_i32, %c0_i32_0, %c0_i32_1 : i32, i32, i32
  }
  func.func @transform_5(%arg0: i32) -> (i32, i32) {
    %c0_i32 = arith.constant 0 : i32
    %c0_i32_0 = arith.constant 0 : i32
    %c0_i32_1 = arith.constant 0 : i32
    return %c0_i32, %c0_i32_0 : i32, i32
  }
  func.func @transform_6(%arg0: i32) -> (i32, i32, i32) {
    %c0_i32 = arith.constant 0 : i32
    %c0_i32_0 = arith.constant 0 : i32
    %c0_i32_1 = arith.constant 0 : i32
    %c0_i32_2 = arith.constant 0 : i32
    return %c0_i32, %c0_i32_0, %c0_i32_1 : i32, i32, i32
  }
  func.func @transform_7(%arg0: i32) -> (i32, i32) {
    %c0_i32 = arith.constant 0 : i32
    %c0_i32_0 = arith.constant 0 : i32
    %c0_i32_1 = arith.constant 0 : i32
    return %c0_i32, %c0_i32_0 : i32, i32
  }
  func.func @transform_8(%arg0: i32) -> (i32, i32) {
    %c0_i32 = arith.constant 0 : i32
    %c0_i32_0 = arith.constant 0 : i32
    %c0_i32_1 = arith.constant 0 : i32
    return %c0_i32, %c0_i32_0 : i32, i32
  }
  func.func @transform_9(%arg0: i32) -> (i32, i32) {
    %c0_i32 = arith.constant 0 : i32
    %c0_i32_0 = arith.constant 0 : i32
    %c0_i32_1 = arith.constant 0 : i32
    return %c0_i32, %c0_i32_0 : i32, i32
  }
  func.func @transform_10(%arg0: i32) -> (i32, i32) {
    %c0_i32 = arith.constant 0 : i32
    %c0_i32_0 = arith.constant 0 : i32
    %c0_i32_1 = arith.constant 0 : i32
    return %c0_i32, %c0_i32_0 : i32, i32
  }
  func.func @transform_11(%arg0: i32) -> (i32, i32, i32) {
    %c0_i32 = arith.constant 0 : i32
    %c0_i32_0 = arith.constant 0 : i32
    %c0_i32_1 = arith.constant 0 : i32
    return %arg0, %c0_i32, %c0_i32_0 : i32, i32, i32
  }
}

</mosaic_0001>

<bundles_post_ra>
// kernel: _lambda_.1
= control target key start
LH: loop header
LB: loop body
LE: loop exit
PB: predicated region body
PF: predicated region fallthrough
CT: control target
= control target key end

     0   :  { %16 = vsyncpa [#allocation3], 0  ;;  %s3736_s0 = inlined_call_operand.vmem [shape: bf16[32,128], index: 0, kind: input, shape index: {}]   ;;  %s3737_s1 = inlined_call_operand.vmem [shape: bf16[32,128], index: 1, kind: input, shape index: {}]   ;;  %s3738_s2 = inlined_call_operand.vmem [shape: bf16[5,128,128], index: 2, kind: input, shape index: {}]   ;;  %s3739_s3 = inlined_call_operand.vmem [shape: f32[1,128], index: 3, kind: input, shape index: {}]   ;;  %s3740_s4 = inlined_call_operand.vmem [shape: bf16[5,128,128], index: 4, kind: input, shape index: {}]   ;;  %s3741_s5 = inlined_call_operand.vmem [shape: f32[1,128], index: 5, kind: input, shape index: {}]   ;;  %s3742_s6 = inlined_call_operand.vmem [shape: bf16[3,128,128], index: 6, kind: input, shape index: {}]   ;;  %s3743_s7 = inlined_call_operand.vmem [shape: f32[1,128], index: 7, kind: input, shape index: {}]   ;;  %s3744_s8 = inlined_call_operand.vmem [shape: bf16[1,6], index: 8, kind: input, shape index: {}]   ;;  %s3745_s9 = inlined_call_operand.vmem [shape: bf16[128,128], index: 9, kind: input, shape index: {}]   ;;  %s3746_s10 = inlined_call_operand.vmem [shape: f32[1,128], index: 10, kind: input, shape index: {}]   ;;  %s3747_s11 = inlined_call_operand.hbm [shape: f32[2,1,128], index: 11, kind: output, shape index: {}]  }
   0x1   :  { %18 = vsyncpa [#allocation3 + $0x1], 0  ;;  %s3123_s17 = smov 0   ;;  %s3125_s18 = smov 0  }
   0x2   :  { %s3127_s19 = smov 0   ;;  %s3129_s20 = smov 0  }
   0x3 LB: > { %s3144_s21 = sadd.s32 4294967295, %s3058_s20   ;;  %s2132_s22 = sadd.s32 4294967294, %s3058_s20   ;;  %s3058_s20 = sphi %s3129_s20, %s3755_s20   ;;  %s3054_s19 = sphi %s3127_s19, %s3754_s19   ;;  %s3050_s18 = sphi %s3125_s18, %s3753_s18   ;;  %s3046_s17 = sphi %s3123_s17, %s3752_s17  }
   0x4   : > { %s3148_s23 = sadd.s32 1, %s3058_s20   ;;  %s272_s24 = sadd.s32 1, %s3054_s19 }
   0x5   : > { %s269_s25 = ssub.s32 %s3058_s20, %s3148_s23  ;;  %p282_p0 = scmp.ne.s32.totalorder %s3054_s19, %s3050_s18 }
   0x6   : > { %p270_p1 = scmp.eq.s32.totalorder %s269_s25, 0  ;;  %p283_p2 = scmp.eq.s32.totalorder %s3144_s21, 1 }
   0x7   : > { %p288_p3 = scmp.ne.s32.totalorder %s3050_s18, %s3046_s17  ;;  %p289_p4 = scmp.eq.s32.totalorder %s2132_s22, 1 }
   0x8   : > { %s3159_s26 = scalar_select %p270_p1, %s3054_s19, %s272_s24  }
   0x9   : > { %p3161_p5 = por %p283_p2, %p282_p0  ;;  %p3165_p6 = por %p289_p4, %p288_p3 }
   0xa   : > { %3748 = sst [smem:[#allocation5_spill]] %s3159_s26  ;;  %p2135_p7 = scmp.ge.s32.totalorder %s3058_s20, 1 }
   0xb   : > { %p352_p8 = scmp.lt.s32.totalorder %s3058_s20, 3 }
   0xd   : > { %p353_p9 = pnand %p2135_p7, %p352_p8 }
   0xe   : > { %v2879_v0 = vld [vmem:[%s3738_s2 + $0x40] sm:$0xff] (!%p353_p9)   ;;  %v3060_v1 = vmov (!%p353_p9), 0.0   ;;  %v2881_v3 = vld [vmem:[%s3738_s2 + $0x48] sm:$0xff] (!%p353_p9)   ;;  %vm3061_vm0 = vmmov (!%p353_p9), 0   ;;  %v2883_v5 = vld [vmem:[%s3738_s2 + $0x50] sm:$0xff] (!%p353_p9)   ;;  %s2136_s12 = sshll.u32 (!%p353_p9), %s3144_s21, 1 }
   0xf   : > { %356 = sbr.rel (%p353_p9) target bundleno = 1325 (0x52d), region = 64  ;;  %2552 = vmatprep.subr.bf16.mxu0 (!%p353_p9), %v3060_v1  ;;  %2572 = vmatprep.subr.bf16.mxu1 (!%p353_p9), %v3060_v1  ;;  %v2880_v2 = vld [vmem:[%s3738_s2] sm:$0xff] (!%p353_p9)   ;;  %v2882_v4 = vld [vmem:[%s3738_s2 + $0x8] sm:$0xff] (!%p353_p9)   ;;  %v2884_v6 = vld [vmem:[%s3738_s2 + $0x10] sm:$0xff] (!%p353_p9)   ;;  %p397_p10 = scmp.lt.s32.totalorder (!%p353_p9), %s2136_s12, 3  ;;  %vm1901_vm1 = vcmask (!%p353_p9), 1042432  }
  0x10   : > { %2553 = vmatpush3.bf16.msra.mxu0 (!%p353_p9), %v2879_v0  ;;  %2568 = vmatprep.mubr.msk.bf16.mxu0 (!%p353_p9), %vm3061_vm0, %v3060_v1  ;;  %v2885_v7 = vld [vmem:[%s3738_s2 + $0x58] sm:$0xff] (!%p353_p9)   ;;  %v2887_v9 = vld [vmem:[%s3738_s2 + $0x60] sm:$0xff] (!%p353_p9)   ;;  %v2889_v11 = vld [vmem:[%s3738_s2 + $0x68] sm:$0xff] (!%p353_p9)   ;;  %vm1897_vm2 = vcmask (!%p353_p9), 48128   ;;  %s394_s22 = sand.u32 (!%p353_p9), 1, %s3050_s18   ;;  %s2421_s25 = sshll.u32 (!%p353_p9), %s3144_s21, 4 }
  0x11   : > { %2573 = vmatpush3.bf16.msra.mxu1 (!%p353_p9), %v2880_v2  ;;  %2554 = vmatprep.subr.bf16.mxu0 (!%p353_p9), %v3060_v1  ;;  %v2886_v8 = vld [vmem:[%s3738_s2 + $0x18] sm:$0xff] (!%p353_p9)   ;;  %v2888_v10 = vld [vmem:[%s3738_s2 + $0x20] sm:$0xff] (!%p353_p9)   ;;  %v2890_v12 = vld [vmem:[%s3738_s2 + $0x28] sm:$0xff] (!%p353_p9)   ;;  %s395_s29 = scalar_lea.vmem (!%p353_p9), [#allocation2], %s394_s22  ;;  %s3694_s13 = scalar_lea.hbm (!%p353_p9), %s3747_s11, %s2421_s25 }
  0x12   : > { %2574 = vmatprep.subr.bf16.mxu1 (!%p353_p9), %v3060_v1  ;;  %2588 = vmatprep.mubr.msk.bf16.mxu1 (!%p353_p9), %vm3061_vm0, %v3060_v1  ;;  %v2891_v13 = vld [vmem:[%s3738_s2 + $0x70] sm:$0xff] (!%p353_p9)   ;;  %v2893_v15 = vld [vmem:[%s3738_s2 + $0x78] sm:$0xff] (!%p353_p9)   ;;  %v2899_v24 = vld [vmem:[%s3738_s2 + $0x80] sm:$0xff] (!%p353_p9)   ;;  %s3062_s15 = smov (!%p353_p9), [#allocation2]  }
  0x13   : > { %v2892_v14 = vld [vmem:[%s3738_s2 + $0x30] sm:$0xff] (!%p353_p9)   ;;  %v2894_v17 = vld [vmem:[%s3738_s2 + $0x38] sm:$0xff] (!%p353_p9)   ;;  %v2900_v25 = vld [vmem:[%s3738_s2 + $0xc0] sm:$0xff] (!%p353_p9)   ;;  %s3000_s24 = sshll.u32 (!%p353_p9), %s3062_s15, 4  ;;  %s3001_s24 = int_to_ptr.vmem [resolvable:$false] %s3000_s24 }
  0x14   : > { %2555 = vmatpush3.bf16.msra.mxu0 (!%p353_p9), %v2881_v3  ;;  %v2901_v28 = vld [vmem:[%s3738_s2 + $0x88] sm:$0xff] (!%p353_p9)   ;;  %v2903_v32 = vld [vmem:[%s3738_s2 + $0x90] sm:$0xff] (!%p353_p9)   ;;  %v2905_v38 = vld [vmem:[%s3738_s2 + $0x98] sm:$0xff] (!%p353_p9)  }
  0x15   : > { %2575 = vmatpush3.bf16.msra.mxu1 (!%p353_p9), %v2882_v4  ;;  %2556 = vmatprep.subr.bf16.mxu0 (!%p353_p9), %v3060_v1  ;;  %v2902_v29 = vld [vmem:[%s3738_s2 + $0xc8] sm:$0xff] (!%p353_p9)   ;;  %v2904_v33 = vld [vmem:[%s3738_s2 + $0xd0] sm:$0xff] (!%p353_p9)   ;;  %v2906_v39 = vld [vmem:[%s3738_s2 + $0xd8] sm:$0xff] (!%p353_p9)  }
  0x16   : > { %2576 = vmatprep.subr.bf16.mxu1 %v3060_v1  ;;  %s3757_s12 = smov (!%p397_p10, %s2136_s12), 3  ;;  %v2907_v40 = vld [vmem:[%s3738_s2 + $0xa0] sm:$0xff]   ;;  %v2909_v43 = vld [vmem:[%s3738_s2 + $0xa8] sm:$0xff]   ;;  %v2911_v45 = vld [vmem:[%s3738_s2 + $0xb0] sm:$0xff]  }
  0x17   : > { %s2137_s14 = sshll.u32 %s3757_s12, 2  ;;  %v2908_v42 = vld [vmem:[%s3738_s2 + $0xe0] sm:$0xff]   ;;  %v2910_v44 = vld [vmem:[%s3738_s2 + $0xe8] sm:$0xff]   ;;  %v2912_v46 = vld [vmem:[%s3738_s2 + $0xf0] sm:$0xff]  }
  0x18   : > { %2557 = vmatpush3.bf16.msra.mxu0 %v2883_v5  ;;  %s406_s26 = scalar_lea.vmem %s3737_s1, %s2137_s14  ;;  %s3237_s16 = scalar_lea.vmem %s3736_s0, %s2137_s14  ;;  %v2913_v47 = vld [vmem:[%s3738_s2 + $0xb8] sm:$0xff]   ;;  %v2915_v49 = vld [vmem:[%s3738_s2 + $0x100] sm:$0xff]   ;;  %v2916_v52 = vld [vmem:[%s3738_s2 + $0x108] sm:$0xff]  }
  0x19   : > { %2577 = vmatpush3.bf16.msra.mxu1 %v2884_v6  ;;  %2558 = vmatprep.subr.bf16.mxu0 %v3060_v1  ;;  %v427_v16 = vld [vmem:[%s406_s26] sm:$0xf]  ;;  %v428_v18 = vld [vmem:[%s406_s26 + $0x4] sm:$0x7]  ;;  %v2914_v48 = vld [vmem:[%s3738_s2 + $0xf8] sm:$0xff]   ;;  %s2065_s14 = sshll.u32 %s395_s29, 4  ;;  %s3696_s14 = int_to_ptr.vmem [resolvable:$true] %s2065_s14 }
  0x1a   : > { %2578 = vmatprep.subr.bf16.mxu1 %v3060_v1  ;;  %v409_v19 = vld [vmem:[%s3237_s16] sm:$0xf]  ;;  %v410_v20 = vld [vmem:[%s3237_s16 + $0x4] sm:$0x7]  ;;  %v2156_v21 = vcombine.low %v427_v16, %v428_v18  ;;  %v2917_v53 = vld [vmem:[%s3738_s2 + $0x110] sm:$0xff]   ;;  %s2996_s21 = scalar_lea.vmem %s3696_s14, 16  ;;  %p3003_p0 = scmp.lt.s32.totalorder %s3696_s14, %s3001_s24 }
  0x1b   : > { %v756_v22 = vld [vmem:[%s406_s26 + $0x4] sm:$0xf]  ;;  %v2165_v23 = vcombine.low %v409_v19, %v410_v20  ;;  %v2918_v54 = vld [vmem:[%s3738_s2 + $0x118] sm:$0xff]   ;;  %v2920_v56 = vld [vmem:[%s3738_s2 + $0x128] sm:$0xff]   ;;  %s2053_s26 = scalar_lea.sflag [#allocation3], %s394_s22  ;;  %p2997_p11 = scmp.ne.s32.totalorder %s3696_s14, %s2996_s21 }
  0x1c   : > { %2559 = vmatpush3.bf16.msra.mxu0 %v2885_v7  ;;  %v3259_v26 = vld [vmem:[%s3237_s16 + $0x4] sm:$0xf]  ;;  %v2215_v27 = vcombine.low %v427_v16, %v756_v22  ;;  %v2921_v57 = vld [vmem:[%s3738_s2 + $0x130] sm:$0xff]   ;;  %v876_v58 = vld [vmem:[%s3237_s16] sm:$0xe]  ;;  %s3002_s16 = scalar_lea.vmem %s3001_s24, 32 }
  0x1d   : > { %2579 = vmatpush3.bf16.msra.mxu1 %v2886_v8  ;;  %2560 = vmatprep.subr.bf16.mxu0 %v3060_v1  ;;  %v2190_v30 = vcombine.low %v409_v19, %v3259_v26  ;;  %v2919_v55 = vld [vmem:[%s3738_s2 + $0x120] sm:$0xff]   ;;  %v2922_v59 = vld [vmem:[%s3738_s2 + $0x138] sm:$0xff]   ;;  %v2240_v60 = vcombine.low %v876_v58, %v3259_v26  ;;  %v2925_v0 = vld [vmem:[%s3740_s4 + $0x8] sm:$0xff]   ;;  %p2998_p12 = pnand %p2997_p11, %p3161_p5  ;;  %p3004_p1 = scmp.lt.s32.totalorder %s3002_s16, %s2996_s21 }
  0x1e   : > { %2580 = vmatprep.subr.bf16.mxu1 %v3060_v1  ;;  %v780_v31 = vshll.u32 %v2215_v27, 16  ;;  %v778_v34 = vshrl.u32 %v2215_v27, 16  ;;  %v2924_v62 = vld [vmem:[%s3740_s4] sm:$0xff]   ;;  %v2928_v2 = vld [vmem:[%s3740_s4 + $0x48] sm:$0xff]   ;;  %v2927_v3 = vld [vmem:[%s3740_s4 + $0x10] sm:$0xff]  }
  0x1f   : > { %v660_v35 = vshll.u32 %v2190_v30, 16  ;;  %v658_v37 = vshrl.u32 %v2190_v30, 16  ;;  %v897_v61 = vrot.slane %v2240_v60, 1  ;;  %v2926_v63 = vld [vmem:[%s3740_s4 + $0x40] sm:$0xff]   ;;  %v2930_v4 = vld [vmem:[%s3740_s4 + $0x50] sm:$0xff]   ;;  %v2929_v5 = vld [vmem:[%s3740_s4 + $0x18] sm:$0xff]   ;;  %p2999_p13 = pneg %p2998_p12  ;;  %p3005_p2 = por %p3004_p1, %p3003_p0 }
  0x20   : > { %2561 = vmatpush3.bf16.msra.mxu0 %v2887_v9  ;;  %v782_v36 = vrot.slane %v780_v31, 1  ;;  %v2932_v6 = vld [vmem:[%s3740_s4 + $0x58] sm:$0xff]   ;;  %v2931_v7 = vld [vmem:[%s3740_s4 + $0x20] sm:$0xff]   ;;  %v2933_v8 = vld [vmem:[%s3740_s4 + $0x28] sm:$0xff]  }
  0x21   : > { %2581 = vmatpush3.bf16.msra.mxu1 %v2888_v10  ;;  %2562 = vmatprep.subr.bf16.mxu0 %v3060_v1  ;;  %v662_v41 = vrot.slane %v660_v35, 1  ;;  %v2934_v9 = vld [vmem:[%s3740_s4 + $0x60] sm:$0xff]   ;;  %v2935_v10 = vld [vmem:[%s3740_s4 + $0x30] sm:$0xff]   ;;  %v2945_v58 = vld [vmem:[%s3740_s4 + $0xd8] sm:$0xff]   ;;  %p3006_p3 = pnand %p3005_p2, %p2999_p13 }
  0x22   : > { %2582 = vmatprep.subr.bf16.mxu1 %v3060_v1  ;;  %v783_v51 = vor.u32 %v782_v36, %v778_v34  ;;  %v2947_v60 = vld [vmem:[%s3740_s4 + $0xe0] sm:$0xff]  }
  0x23   : > { %v663_v50 = vor.u32 %v662_v41, %v658_v37 }
  0x24   : > { %2563 = vmatpush3.bf16.msra.mxu0 %v2889_v11  ;;  %v2936_v11 = vld [vmem:[%s3740_s4 + $0x68] sm:$0xff]  }
  0x25   : > { %2583 = vmatpush3.bf16.msra.mxu1 %v2890_v12  ;;  %2564 = vmatprep.subr.bf16.mxu0 %v3060_v1  ;;  %v2937_v12 = vld [vmem:[%s3740_s4 + $0x38] sm:$0xff]  }
  0x26   : > { %2584 = vmatprep.subr.bf16.mxu1 %v3060_v1 }
  0x28   : > { %2565 = vmatpush3.bf16.msra.mxu0 %v2891_v13  ;;  %v2938_v13 = vld [vmem:[%s3740_s4 + $0x70] sm:$0xff]  }
  0x29   : > { %2585 = vmatpush3.bf16.msra.mxu1 %v2892_v14  ;;  %2566 = vmatprep.subr.bf16.mxu0 %v3060_v1  ;;  %v2940_v14 = vld [vmem:[%s3740_s4 + $0x78] sm:$0xff]  }
  0x2a   : > { %2586 = vmatprep.subr.bf16.mxu1 %v3060_v1 }
  0x2c   : > { %2567 = vmatpush3.bf16.msra.mxu0 %v2893_v15 }
  0x2d   : > { %2587 = vmatpush3.bf16.msra.mxu1 %v2894_v17  ;;  %2592 = vmatprep.subr.bf16.mxu0 %v3060_v1 }
  0x2e   : > { %2612 = vmatprep.subr.bf16.mxu1 %v3060_v1 }
  0x2f   : > { %2569 = vmatmul.mubr.bf16.vlgmr.msra.gmra.mrb[0].mxu0 %v2156_v21 }
  0x30   : > { %2589 = vmatmul.mubr.bf16.vlgmr.msra.gmra.mrb[0].mxu1 %v2165_v23  ;;  %2593 = vmatpush3.bf16.msra.mxu0 %v2899_v24 }
  0x31   : > { %2613 = vmatpush3.bf16.msra.mxu1 %v2900_v25  ;;  %2594 = vmatprep.subr.bf16.mxu0 %v3060_v1 }
  0x32   : > { %2614 = vmatprep.subr.bf16.mxu1 %v3060_v1  ;;  %2608 = vmatprep.mubr.msk.bf16.mxu0 %vm3061_vm0, %v3060_v1 }
  0x33   : > { %2628 = vmatprep.mubr.msk.bf16.mxu1 %vm3061_vm0, %v3060_v1 }
  0x34   : > { %2595 = vmatpush3.bf16.msra.mxu0 %v2901_v28 }
  0x35   : > { %2615 = vmatpush3.bf16.msra.mxu1 %v2902_v29  ;;  %2596 = vmatprep.subr.bf16.mxu0 %v3060_v1 }
  0x36   : > { %2616 = vmatprep.subr.bf16.mxu1 %v3060_v1 }
  0x38   : > { %2597 = vmatpush3.bf16.msra.mxu0 %v2903_v32 }
  0x39   : > { %2617 = vmatpush3.bf16.msra.mxu1 %v2904_v33  ;;  %2598 = vmatprep.subr.bf16.mxu0 %v3060_v1 }
  0x3a   : > { %2618 = vmatprep.subr.bf16.mxu1 %v3060_v1 }
  0x3c   : > { %2599 = vmatpush3.bf16.msra.mxu0 %v2905_v38  ;;  %v2249_v38 = vld [vmem:[%s3739_s3] ss:$0 sm:$0xff] }
  0x3d   : > { %2619 = vmatpush3.bf16.msra.mxu1 %v2906_v39  ;;  %2600 = vmatprep.subr.bf16.mxu0 %v3060_v1 }
  0x3e   : > { %2620 = vmatprep.subr.bf16.mxu1 %v3060_v1 }
  0x40   : > { %2601 = vmatpush3.bf16.msra.mxu0 %v2907_v40 }
  0x41   : > { %2621 = vmatpush3.bf16.msra.mxu1 %v2908_v42  ;;  %2602 = vmatprep.subr.bf16.mxu0 %v3060_v1 }
  0x42   : > { %2622 = vmatprep.subr.bf16.mxu1 %v3060_v1 }
  0x44   : > { %2603 = vmatpush3.bf16.msra.mxu0 %v2909_v43 }
  0x45   : > { %2623 = vmatpush3.bf16.msra.mxu1 %v2910_v44  ;;  %2604 = vmatprep.subr.bf16.mxu0 %v3060_v1 }
  0x46   : > { %2624 = vmatprep.subr.bf16.mxu1 %v3060_v1 }
  0x48   : > { %2605 = vmatpush3.bf16.msra.mxu0 %v2911_v45 }
  0x49   : > { %2625 = vmatpush3.bf16.msra.mxu1 %v2912_v46  ;;  %2606 = vmatprep.subr.bf16.mxu0 %v3060_v1 }
  0x4a   : > { %2626 = vmatprep.subr.bf16.mxu1 %v3060_v1 }
  0x4c   : > { %2607 = vmatpush3.bf16.msra.mxu0 %v2913_v47 }
  0x4d   : > { %2627 = vmatpush3.bf16.msra.mxu1 %v2914_v48  ;;  %2632 = vmatprep.subr.bf16.mxu0 %v3060_v1  ;;  %v2939_v48 = vld [vmem:[%s3740_s4 + $0xc0] sm:$0xff]  }
  0x4e   : > { %2652 = vmatprep.subr.bf16.mxu1 %v3060_v1 }
  0x4f   : > { %2609 = vmatmul.mubr.bf16.vlgmr.msra.gmra.mrb[4].mxu0 %v663_v50 }
  0x50   : > { %2633 = vmatpush3.bf16.msra.mxu0 %v2915_v49  ;;  %2629 = vmatmul.mubr.bf16.vlgmr.msra.gmra.mrb[4].mxu1 %v783_v51  ;;  %v2941_v51 = vld [vmem:[%s3740_s4 + $0xc8] sm:$0xff]  }
  0x51   : > { %2634 = vmatprep.subr.bf16.mxu0 %v3060_v1  ;;  %2648 = vmatprep.mubr.msk.bf16.mxu0 %vm3061_vm0, %v3060_v1 }
  0x52   : > { %2668 = vmatprep.mubr.msk.bf16.mxu1 %vm3061_vm0, %v3060_v1  ;;  %2653 = vmatpush3.bf16.msra.mxu1 %v2926_v63  ;;  %v2950_v63 = vld [vmem:[%s3740_s4 + $0xa0] sm:$0xff]  }
  0x53   : > { %2654 = vmatprep.subr.bf16.mxu1 %v3060_v1 }
  0x54   : > { %2635 = vmatpush3.bf16.msra.mxu0 %v2916_v52 }
  0x55   : > { %2636 = vmatprep.subr.bf16.mxu0 %v3060_v1 }
  0x56   : > { %2655 = vmatpush3.bf16.msra.mxu1 %v2928_v2  ;;  %v2952_v2 = vld [vmem:[%s3740_s4 + $0xa8] sm:$0xff]  }
  0x57   : > { %2656 = vmatprep.subr.bf16.mxu1 %v3060_v1 }
  0x58   : > { %2637 = vmatpush3.bf16.msra.mxu0 %v2917_v53 }
  0x59   : > { %2638 = vmatprep.subr.bf16.mxu0 %v3060_v1 }
  0x5a   : > { %2657 = vmatpush3.bf16.msra.mxu1 %v2930_v4 }
  0x5b   : > { %2658 = vmatprep.subr.bf16.mxu1 %v3060_v1 }
  0x5c   : > { %2639 = vmatpush3.bf16.msra.mxu0 %v2918_v54  ;;  %v2942_v54 = vld [vmem:[%s3740_s4 + $0x80] sm:$0xff]  }
  0x5d   : > { %2640 = vmatprep.subr.bf16.mxu0 %v3060_v1 }
  0x5e   : > { %2659 = vmatpush3.bf16.msra.mxu1 %v2932_v6  ;;  %v2954_v6 = vld [vmem:[%s3740_s4 + $0xb0] sm:$0xff]  }
  0x5f   : > { %2660 = vmatprep.subr.bf16.mxu1 %v3060_v1 }
  0x60   : > { %2641 = vmatpush3.bf16.msra.mxu0 %v2919_v55 }
  0x61   : > { %2642 = vmatprep.subr.bf16.mxu0 %v3060_v1 }
  0x62   : > { %2661 = vmatpush3.bf16.msra.mxu1 %v2934_v9  ;;  %v2956_v9 = vld [vmem:[%s3740_s4 + $0x100] sm:$0xff]  }
  0x63   : > { %2662 = vmatprep.subr.bf16.mxu1 %v3060_v1 }
  0x64   : > { %2643 = vmatpush3.bf16.msra.mxu0 %v2920_v56  ;;  %v2943_v56 = vld [vmem:[%s3740_s4 + $0xd0] sm:$0xff]  }
  0x65   : > { %2644 = vmatprep.subr.bf16.mxu0 %v3060_v1 }
  0x66   : > { %2663 = vmatpush3.bf16.msra.mxu1 %v2936_v11  ;;  %v2957_v11 = vld [vmem:[%s3740_s4 + $0x108] sm:$0xff]  }
  0x67   : > { %2664 = vmatprep.subr.bf16.mxu1 %v3060_v1 }
  0x68   : > { %2645 = vmatpush3.bf16.msra.mxu0 %v2921_v57  ;;  %v2944_v57 = vld [vmem:[%s3740_s4 + $0x88] sm:$0xff]  }
  0x69   : > { %2646 = vmatprep.subr.bf16.mxu0 %v3060_v1 }
  0x6a   : > { %2665 = vmatpush3.bf16.msra.mxu1 %v2938_v13  ;;  %v2959_v13 = vld [vmem:[%s3740_s4 + $0x118] sm:$0xff]  }
  0x6b   : > { %2666 = vmatprep.subr.bf16.mxu1 %v3060_v1 }
  0x6c   : > { %2647 = vmatpush3.bf16.msra.mxu0 %v2922_v59  ;;  %v2946_v59 = vld [vmem:[%s3740_s4 + $0x90] sm:$0xff]  }
  0x6d   : > { %2672 = vmatprep.subr.bf16.mxu0 %v3060_v1 }
  0x6e   : > { %2667 = vmatpush3.bf16.msra.mxu1 %v2940_v14  ;;  %v2960_v14 = vld [vmem:[%s3740_s4 + $0x120] sm:$0xff]  }
  0x6f   : > { %2649 = vmatmul.mubr.bf16.vlgmr.msra.gmra.mrb[8].mxu0 %v897_v61  ;;  %2692 = vmatprep.subr.bf16.mxu1 %v3060_v1  ;;  %v2948_v61 = vld [vmem:[%s3740_s4 + $0x98] sm:$0xff]  }
  0x70   : > { %2688 = vmatprep.mubr.msk.bf16.mxu0 %vm3061_vm0, %v3060_v1  ;;  %2673 = vmatpush3.bf16.msra.mxu0 %v2924_v62  ;;  %v2949_v62 = vld [vmem:[%s3740_s4 + $0xe8] sm:$0xff]  }
  0x71   : > { %2674 = vmatprep.subr.bf16.mxu0 %v3060_v1 }
  0x74   : > { %2675 = vmatpush3.bf16.msra.mxu0 %v2925_v0  ;;  %v2951_v0 = vld [vmem:[%s3740_s4 + $0xf0] sm:$0xff]  }
  0x75   : > { %2676 = vmatprep.subr.bf16.mxu0 %v3060_v1 }
  0x78   : > { %2677 = vmatpush3.bf16.msra.mxu0 %v2927_v3  ;;  %v2953_v3 = vld [vmem:[%s3740_s4 + $0xf8] sm:$0xff]  }
  0x79   : > { %2678 = vmatprep.subr.bf16.mxu0 %v3060_v1 }
  0x7c   : > { %2679 = vmatpush3.bf16.msra.mxu0 %v2929_v5 }
  0x7d   : > { %2680 = vmatprep.subr.bf16.mxu0 %v3060_v1 }
  0x80   : > { %2681 = vmatpush3.bf16.msra.mxu0 %v2931_v7 }
  0x81   : > { %2682 = vmatprep.subr.bf16.mxu0 %v3060_v1 }
  0x84   : > { %2683 = vmatpush3.bf16.msra.mxu0 %v2933_v8  ;;  %v2955_v8 = vld [vmem:[%s3740_s4 + $0xb8] sm:$0xff]  }
  0x85   : > { %2684 = vmatprep.subr.bf16.mxu0 %v3060_v1 }
  0x88   : > { %2685 = vmatpush3.bf16.msra.mxu0 %v2935_v10 }
  0x89   : > { %2686 = vmatprep.subr.bf16.mxu0 %v3060_v1 }
  0x8c   : > { %2687 = vmatpush3.bf16.msra.mxu0 %v2937_v12  ;;  %v2958_v12 = vld [vmem:[%s3740_s4 + $0x110] sm:$0xff]  }
  0x8d   : > { %2712 = vmatprep.subr.bf16.mxu0 %v3060_v1 }
 0x102   : > { %v534_v15 = vpop.f32.mrb[0].mxu0 }
 0x103   : > { %v629_v16 = vpop.f32.mrb[0].mxu1  ;;  %v2570_v17 = vpop.f32.mrb[1].mxu0 }
 0x104   : > { %v630_v18 = vadd.f32 %v629_v16, %v534_v15  ;;  %v2590_v19 = vpop.f32.mrb[1].mxu1  ;;  %v537_v20 = vpop.f32.mrb[2].mxu0  ;;  %v2961_v15 = vld [vmem:[%s3740_s4 + $0x128] sm:$0xff]   ;;  %v2962_v16 = vld [vmem:[%s3740_s4 + $0x130] sm:$0xff]   ;;  %v2963_v17 = vld [vmem:[%s3740_s4 + $0x138] sm:$0xff]  }
 0x105   : > { %v632_v21 = vpop.f32.mrb[2].mxu1  ;;  %v2571_v22 = vpop.f32.mrb[3].mxu0  ;;  %v2964_v19 = vld [vmem:[%s3742_s6] sm:$0xff]  }
 0x106   : > { %v633_v23 = vadd.f32 %v632_v21, %v537_v20  ;;  %v2591_v24 = vpop.f32.mrb[3].mxu1  ;;  %v2965_v20 = vld [vmem:[%s3742_s6 + $0x40] sm:$0xff]   ;;  %v2966_v21 = vld [vmem:[%s3742_s6 + $0x8] sm:$0xff]  }
 0x107   : > { %v2967_v22 = vld [vmem:[%s3742_s6 + $0x48] sm:$0xff]   ;;  %v2969_v24 = vld [vmem:[%s3742_s6 + $0x50] sm:$0xff]  }
 0x122   : > { %v747_v25 = vpop.f32.mrb[4].mxu0 }
 0x123   : > { %v754_v26 = vadd.f32 %v747_v25, %v630_v18  ;;  %v2610_v27 = vpop.f32.mrb[5].mxu0  ;;  %v867_v28 = vpop.f32.mrb[4].mxu1  ;;  %v2970_v25 = vld [vmem:[%s3742_s6 + $0x18] sm:$0xff]  }
 0x124   : > { %v750_v29 = vpop.f32.mrb[6].mxu0  ;;  %v2630_v30 = vpop.f32.mrb[5].mxu1  ;;  %v2972_v27 = vld [vmem:[%s3742_s6 + $0x20] sm:$0xff]  }
 0x125   : > { %v755_v31 = vadd.f32 %v750_v29, %v633_v23  ;;  %v874_v32 = vadd.f32 %v867_v28, %v754_v26  ;;  %v2611_v33 = vpop.f32.mrb[7].mxu0  ;;  %v870_v34 = vpop.f32.mrb[6].mxu1  ;;  %v2968_v23 = vld [vmem:[%s3742_s6 + $0x10] sm:$0xff]   ;;  %v2971_v26 = vld [vmem:[%s3742_s6 + $0x58] sm:$0xff]   ;;  %v2973_v28 = vld [vmem:[%s3742_s6 + $0x60] sm:$0xff]  }
 0x126   : > { %v2631_v35 = vpop.f32.mrb[7].mxu1  ;;  %v2974_v29 = vld [vmem:[%s3742_s6 + $0x28] sm:$0xff]   ;;  %v2978_v33 = vld [vmem:[%s3742_s6 + $0x38] sm:$0xff]  }
 0x127   : > { %v875_v36 = vadd.f32 %v870_v34, %v755_v31  ;;  %v2975_v30 = vld [vmem:[%s3742_s6 + $0x68] sm:$0xff]   ;;  %v2976_v31 = vld [vmem:[%s3742_s6 + $0x30] sm:$0xff]   ;;  %v2979_v34 = vld [vmem:[%s3742_s6 + $0x78] sm:$0xff]  }
 0x142   : > { %v981_v37 = vpop.f32.mrb[8].mxu0 }
 0x143   : > { %v988_v39 = vadd.f32 %v981_v37, %v874_v32  ;;  %v2650_v40 = vpop.f32.mrb[9].mxu0  ;;  %v2977_v32 = vld [vmem:[%s3742_s6 + $0x70] sm:$0xff]  }
 0x144   : > { %v984_v41 = vpop.f32.mrb[10].mxu0 }
 0x145   : > { %v997_v42 = vadd.f32 %v2249_v38, %v988_v39  ;;  %v989_v43 = vadd.f32 %v984_v41, %v875_v36  ;;  %v2651_v44 = vpop.f32.mrb[11].mxu0 }
 0x147   : > { %v998_v45 = vadd.f32 %v2249_v38, %v989_v43  ;;  %v999_v46 = vmax.f32 %v997_v42, 0.0 }
 0x149   : > { %v1000_v47 = vmax.f32 %v998_v45, 0.0 }
 0x14b   : > { %v3434_v49 = vpack.c.bf16 %v1000_v47, %v999_v46 }
 0x14d   : > { %2689 = vmatmul.mubr.bf16.vlgmr.msra.gmra.mrb[12].mxu0 %v3434_v49  ;;  %v1038_v50 = vshll.u32 %v3434_v49, 16  ;;  %v1036_v52 = vshrl.u32 %v3434_v49, 16  ;;  %v1239_v10 = vrot.slane %v3434_v49, 1  ;;  %v1461_v18 = vrot.slane %v3434_v49, 2 }
 0x14e   : > { %2713 = vmatpush3.bf16.msra.mxu0 %v2939_v48  ;;  %2728 = vmatprep.mubr.msk.bf16.mxu0 %vm3061_vm0, %v3060_v1 }
 0x14f   : > { %2714 = vmatprep.subr.bf16.mxu0 %v3060_v1  ;;  %v1040_v53 = vrot.slane %v1038_v50, 1  ;;  %v1349_v4 = vrot.slane %v1036_v52, 1  ;;  %v1350_v5 = vrot.slane %v1038_v50, 2 }
 0x151   : > { %v1041_v55 = vor.u32 %v1040_v53, %v1036_v52  ;;  %v1351_v7 = vor.u32 %v1350_v5, %v1349_v4 }
 0x152   : > { %2715 = vmatpush3.bf16.msra.mxu0 %v2941_v51 }
 0x153   : > { %2669 = vmatmul.mubr.bf16.vlgmr.msra.gmra.mrb[8].mxu1 %v1041_v55  ;;  %2716 = vmatprep.subr.bf16.mxu0 %v3060_v1 }
 0x154   : > { %2693 = vmatpush3.bf16.msra.mxu1 %v2942_v54  ;;  %2708 = vmatprep.mubr.msk.bf16.mxu1 %vm3061_vm0, %v3060_v1 }
 0x155   : > { %2694 = vmatprep.subr.bf16.mxu1 %v3060_v1 }
 0x156   : > { %2717 = vmatpush3.bf16.msra.mxu0 %v2943_v56 }
 0x157   : > { %2718 = vmatprep.subr.bf16.mxu0 %v3060_v1 }
 0x158   : > { %2695 = vmatpush3.bf16.msra.mxu1 %v2944_v57 }
 0x159   : > { %2696 = vmatprep.subr.bf16.mxu1 %v3060_v1 }
 0x15a   : > { %2719 = vmatpush3.bf16.msra.mxu0 %v2945_v58  ;;  %v2354_v58 = vld [vmem:[%s3741_s5] ss:$0 sm:$0xff] }
 0x15b   : > { %2720 = vmatprep.subr.bf16.mxu0 %v3060_v1 }
 0x15c   : > { %2697 = vmatpush3.bf16.msra.mxu1 %v2946_v59 }
 0x15d   : > { %2698 = vmatprep.subr.bf16.mxu1 %v3060_v1 }
 0x15e   : > { %2721 = vmatpush3.bf16.msra.mxu0 %v2947_v60 }
 0x15f   : > { %2722 = vmatprep.subr.bf16.mxu0 %v3060_v1 }
 0x160   : > { %2699 = vmatpush3.bf16.msra.mxu1 %v2948_v61 }
 0x161   : > { %2700 = vmatprep.subr.bf16.mxu1 %v3060_v1 }
 0x162   : > { %2723 = vmatpush3.bf16.msra.mxu0 %v2949_v62 }
 0x163   : > { %2724 = vmatprep.subr.bf16.mxu0 %v3060_v1 }
 0x164   : > { %2701 = vmatpush3.bf16.msra.mxu1 %v2950_v63 }
 0x165   : > { %2702 = vmatprep.subr.bf16.mxu1 %v3060_v1 }
 0x166   : > { %2725 = vmatpush3.bf16.msra.mxu0 %v2951_v0 }
 0x167   : > { %2726 = vmatprep.subr.bf16.mxu0 %v3060_v1 }
 0x168   : > { %2703 = vmatpush3.bf16.msra.mxu1 %v2952_v2 }
 0x169   : > { %2704 = vmatprep.subr.bf16.mxu1 %v3060_v1 }
 0x16a   : > { %2727 = vmatpush3.bf16.msra.mxu0 %v2953_v3 }
 0x16b   : > { %2752 = vmatprep.subr.bf16.mxu0 %v3060_v1 }
 0x16c   : > { %2705 = vmatpush3.bf16.msra.mxu1 %v2954_v6  ;;  %v2980_v6 = vld [vmem:[%s3742_s6 + $0x80] sm:$0xff]  }
 0x16d   : > { %2729 = vmatmul.mubr.bf16.vlgmr.msra.gmra.mrb[16].mxu0 %v1351_v7  ;;  %2706 = vmatprep.subr.bf16.mxu1 %v3060_v1 }
 0x16e   : > { %2768 = vmatprep.mubr.msk.bf16.mxu0 %vm3061_vm0, %v3060_v1  ;;  %2753 = vmatpush3.bf16.msra.mxu0 %v2965_v20 }
 0x16f   : > { %2754 = vmatprep.subr.bf16.mxu0 %v3060_v1 }
 0x170   : > { %2707 = vmatpush3.bf16.msra.mxu1 %v2955_v8  ;;  %v2981_v8 = vld [vmem:[%s3742_s6 + $0x88] sm:$0xff]  }
 0x171   : > { %2732 = vmatprep.subr.bf16.mxu1 %v3060_v1 }
 0x172   : > { %2755 = vmatpush3.bf16.msra.mxu0 %v2967_v22 }
 0x173   : > { %2709 = vmatmul.mubr.bf16.vlgmr.msra.gmra.mrb[12].mxu1 %v1239_v10  ;;  %2756 = vmatprep.subr.bf16.mxu0 %v3060_v1  ;;  %v2983_v10 = vld [vmem:[%s3742_s6 + $0x98] sm:$0xff]  }
 0x174   : > { %2733 = vmatpush3.bf16.msra.mxu1 %v2956_v9  ;;  %2748 = vmatprep.mubr.msk.bf16.mxu1 %vm3061_vm0, %v3060_v1  ;;  %v2982_v9 = vld [vmem:[%s3742_s6 + $0x90] sm:$0xff]  }
 0x175   : > { %2734 = vmatprep.subr.bf16.mxu1 %v3060_v1 }
 0x176   : > { %2757 = vmatpush3.bf16.msra.mxu0 %v2969_v24 }
 0x177   : > { %2758 = vmatprep.subr.bf16.mxu0 %v3060_v1 }
 0x178   : > { %2735 = vmatpush3.bf16.msra.mxu1 %v2957_v11  ;;  %v2984_v11 = vld [vmem:[%s3742_s6 + $0xa0] sm:$0xff]  }
 0x179   : > { %2736 = vmatprep.subr.bf16.mxu1 %v3060_v1 }
 0x17a   : > { %2759 = vmatpush3.bf16.msra.mxu0 %v2971_v26  ;;  %v2411_v26 = vld [vmem:[%s3743_s7] ss:$0 sm:$0xff] }
 0x17b   : > { %2760 = vmatprep.subr.bf16.mxu0 %v3060_v1 }
 0x17c   : > { %2737 = vmatpush3.bf16.msra.mxu1 %v2958_v12  ;;  %v2985_v12 = vld [vmem:[%s3742_s6 + $0xa8] sm:$0xff]  }
 0x17d   : > { %2738 = vmatprep.subr.bf16.mxu1 %v3060_v1 }
 0x17e   : > { %2761 = vmatpush3.bf16.msra.mxu0 %v2973_v28 }
 0x17f   : > { %2762 = vmatprep.subr.bf16.mxu0 %v3060_v1 }
 0x180   : > { %2739 = vmatpush3.bf16.msra.mxu1 %v2959_v13  ;;  %v2986_v13 = vld [vmem:[%s3742_s6 + $0xb0] sm:$0xff]  }
 0x181   : > { %2740 = vmatprep.subr.bf16.mxu1 %v3060_v1 }
 0x182   : > { %2763 = vmatpush3.bf16.msra.mxu0 %v2975_v30 }
 0x183   : > { %2764 = vmatprep.subr.bf16.mxu0 %v3060_v1 }
 0x184   : > { %2741 = vmatpush3.bf16.msra.mxu1 %v2960_v14  ;;  %v2987_v14 = vld [vmem:[%s3742_s6 + $0xb8] sm:$0xff]  }
 0x185   : > { %2742 = vmatprep.subr.bf16.mxu1 %v3060_v1 }
 0x186   : > { %2765 = vmatpush3.bf16.msra.mxu0 %v2977_v32 }
 0x187   : > { %2766 = vmatprep.subr.bf16.mxu0 %v3060_v1 }
 0x188   : > { %2743 = vmatpush3.bf16.msra.mxu1 %v2961_v15 }
 0x189   : > { %2744 = vmatprep.subr.bf16.mxu1 %v3060_v1 }
 0x18a   : > { %2767 = vmatpush3.bf16.msra.mxu0 %v2979_v34 }
 0x18b   : > { %2792 = vmatprep.subr.bf16.mxu0 %v3060_v1 }
 0x18c   : > { %2745 = vmatpush3.bf16.msra.mxu1 %v2962_v16 }
 0x18d   : > { %2746 = vmatprep.subr.bf16.mxu1 %v3060_v1 }
 0x190   : > { %2747 = vmatpush3.bf16.msra.mxu1 %v2963_v17 }
 0x191   : > { %2772 = vmatprep.subr.bf16.mxu1 %v3060_v1 }
 0x193   : > { %2749 = vmatmul.mubr.bf16.vlgmr.msra.gmra.mrb[16].mxu1 %v1461_v18 }
 0x194   : > { %2788 = vmatprep.mubr.msk.bf16.mxu1 %vm3061_vm0, %v3060_v1  ;;  %2773 = vmatpush3.bf16.msra.mxu1 %v2964_v19 }
 0x195   : > { %2774 = vmatprep.subr.bf16.mxu1 %v3060_v1 }
 0x198   : > { %2775 = vmatpush3.bf16.msra.mxu1 %v2966_v21 }
 0x199   : > { %2776 = vmatprep.subr.bf16.mxu1 %v3060_v1 }
 0x19c   : > { %2777 = vmatpush3.bf16.msra.mxu1 %v2968_v23 }
 0x19d   : > { %2778 = vmatprep.subr.bf16.mxu1 %v3060_v1 }
 0x1a0   : > { %2779 = vmatpush3.bf16.msra.mxu1 %v2970_v25 }
 0x1a1   : > { %2780 = vmatprep.subr.bf16.mxu1 %v3060_v1 }
 0x1a4   : > { %2781 = vmatpush3.bf16.msra.mxu1 %v2972_v27 }
 0x1a5   : > { %2782 = vmatprep.subr.bf16.mxu1 %v3060_v1 }
 0x1a8   : > { %2783 = vmatpush3.bf16.msra.mxu1 %v2974_v29 }
 0x1a9   : > { %2784 = vmatprep.subr.bf16.mxu1 %v3060_v1 }
 0x1ac   : > { %2785 = vmatpush3.bf16.msra.mxu1 %v2976_v31 }
 0x1ad   : > { %2786 = vmatprep.subr.bf16.mxu1 %v3060_v1 }
 0x1b0   : > { %2787 = vmatpush3.bf16.msra.mxu1 %v2978_v33 }
 0x1b1   : > { %2812 = vmatprep.subr.bf16.mxu1 %v3060_v1 }
 0x220   : > { %v1214_v35 = vpop.f32.mrb[12].mxu0 }
 0x221   : > { %v2690_v36 = vpop.f32.mrb[13].mxu0 }
 0x222   : > { %v1217_v37 = vpop.f32.mrb[14].mxu0  ;;  %v2988_v36 = vld [vmem:[%s3745_s9] sm:$0xff]  }
 0x223   : > { %v2691_v38 = vpop.f32.mrb[15].mxu0 }
 0x224   : > { %v2990_v38 = vld [vmem:[%s3745_s9 + $0x10] sm:$0xff]  }
 0x226   : > { %v1125_v39 = vpop.f32.mrb[8].mxu1 }
 0x227   : > { %v1215_v40 = vadd.f32 %v1214_v35, %v1125_v39  ;;  %v2670_v41 = vpop.f32.mrb[9].mxu1  ;;  %v1896_v35 = vld [vmem:[%s3744_s8] sm:$0x1]  ;;  %v2991_v39 = vld [vmem:[%s3745_s9 + $0x18] sm:$0xff]  }
 0x228   : > { %v1128_v42 = vpop.f32.mrb[10].mxu1  ;;  %v2993_v41 = vld [vmem:[%s3745_s9 + $0x28] sm:$0xff]  }
 0x229   : > { %v1218_v43 = vadd.f32 %v1217_v37, %v1128_v42  ;;  %v2671_v44 = vpop.f32.mrb[11].mxu1  ;;  %v2989_v37 = vld [vmem:[%s3745_s9 + $0x8] sm:$0xff]   ;;  %v2994_v42 = vld [vmem:[%s3745_s9 + $0x30] sm:$0xff]  }
 0x240   : > { %v1435_v45 = vpop.f32.mrb[16].mxu0 }
 0x241   : > { %v2730_v46 = vpop.f32.mrb[17].mxu0 }
 0x242   : > { %v1438_v47 = vpop.f32.mrb[18].mxu0 }
 0x243   : > { %v2731_v48 = vpop.f32.mrb[19].mxu0 }
 0x246   : > { %v1323_v49 = vpop.f32.mrb[12].mxu1 }
 0x247   : > { %v1330_v50 = vadd.f32 %v1323_v49, %v1215_v40  ;;  %v2710_v51 = vpop.f32.mrb[13].mxu1  ;;  %v2992_v40 = vld [vmem:[%s3745_s9 + $0x20] sm:$0xff]  }
 0x248   : > { %v1326_v52 = vpop.f32.mrb[14].mxu1  ;;  %v1962_v49 = vld [vmem:[%s3746_s10] sm:$0x1] }
 0x249   : > { %v1331_v53 = vadd.f32 %v1326_v52, %v1218_v43  ;;  %v2711_v54 = vpop.f32.mrb[15].mxu1  ;;  %v1442_v55 = vadd.f32 %v1435_v45, %v1330_v50  ;;  %v2995_v43 = vld [vmem:[%s3745_s9 + $0x38] sm:$0xff]  }
 0x24b   : > { %v1443_v56 = vadd.f32 %v1438_v47, %v1331_v53 }
 0x266   : > { %v1545_v57 = vpop.f32.mrb[16].mxu1 }
 0x267   : > { %v1552_v59 = vadd.f32 %v1545_v57, %v1442_v55  ;;  %v2750_v60 = vpop.f32.mrb[17].mxu1 }
 0x268   : > { %v1548_v61 = vpop.f32.mrb[18].mxu1 }
 0x269   : > { %v1561_v62 = vadd.f32 %v2354_v58, %v1552_v59  ;;  %v1553_v63 = vadd.f32 %v1548_v61, %v1443_v56  ;;  %v2751_v0 = vpop.f32.mrb[19].mxu1 }
 0x26b   : > { %v1562_v2 = vadd.f32 %v2354_v58, %v1553_v63  ;;  %v1563_v3 = vmax.f32 %v1561_v62, 0.0 }
 0x26d   : > { %v1564_v4 = vmax.f32 %v1562_v2, 0.0 }
 0x26f   : > { %v1565_v5 = vpack.c.bf16 %v1564_v4, %v1563_v3 }
 0x271   : > { %2789 = vmatmul.mubr.bf16.vlgmr.msra.gmra.mrb[20].mxu1 %v1565_v5  ;;  %v1600_v7 = vrot.slane %v1565_v5, 1  ;;  %v1795_v15 = vrot.slane %v1565_v5, 2 }
 0x272   : > { %2814 = vmatprep.mubr.msk.bf16.mxu1 %vm3061_vm0, %v3060_v1 }
 0x273   : > { %2769 = vmatmul.mubr.bf16.vlgmr.msra.gmra.mrb[20].mxu0 %v1600_v7 }
 0x274   : > { %2793 = vmatpush3.bf16.msra.mxu0 %v2980_v6  ;;  %2808 = vmatprep.mubr.msk.bf16.mxu0 %vm3061_vm0, %v3060_v1 }
 0x275   : > { %2794 = vmatprep.subr.bf16.mxu0 %v3060_v1 }
 0x278   : > { %2795 = vmatpush3.bf16.msra.mxu0 %v2981_v8 }
 0x279   : > { %2796 = vmatprep.subr.bf16.mxu0 %v3060_v1 }
 0x27c   : > { %2797 = vmatpush3.bf16.msra.mxu0 %v2982_v9 }
 0x27d   : > { %2798 = vmatprep.subr.bf16.mxu0 %v3060_v1 }
 0x280   : > { %2799 = vmatpush3.bf16.msra.mxu0 %v2983_v10 }
 0x281   : > { %2800 = vmatprep.subr.bf16.mxu0 %v3060_v1 }
 0x284   : > { %2801 = vmatpush3.bf16.msra.mxu0 %v2984_v11 }
 0x285   : > { %2802 = vmatprep.subr.bf16.mxu0 %v3060_v1 }
 0x288   : > { %2803 = vmatpush3.bf16.msra.mxu0 %v2985_v12 }
 0x289   : > { %2804 = vmatprep.subr.bf16.mxu0 %v3060_v1 }
 0x28c   : > { %2805 = vmatpush3.bf16.msra.mxu0 %v2986_v13 }
 0x28d   : > { %2806 = vmatprep.subr.bf16.mxu0 %v3060_v1 }
 0x290   : > { %2807 = vmatpush3.bf16.msra.mxu0 %v2987_v14 }
 0x293   : > { %2809 = vmatmul.mubr.bf16.vlgmr.msra.gmra.mrb[24].mxu0 %v1795_v15 }
 0x344   : > { %v1772_v16 = vpop.f32.mrb[20].mxu1 }
 0x345   : > { %v2790_v17 = vpop.f32.mrb[21].mxu1 }
 0x346   : > { %v1684_v18 = vpop.f32.mrb[20].mxu0  ;;  %v1775_v19 = vpop.f32.mrb[22].mxu1 }
 0x347   : > { %v1773_v20 = vadd.f32 %v1772_v16, %v1684_v18  ;;  %v2770_v21 = vpop.f32.mrb[21].mxu0  ;;  %v2791_v22 = vpop.f32.mrb[23].mxu1 }
 0x348   : > { %v1687_v23 = vpop.f32.mrb[22].mxu0 }
 0x349   : > { %v2771_v24 = vpop.f32.mrb[23].mxu0 }
 0x366   : > { %v1879_v25 = vpop.f32.mrb[24].mxu0 }
 0x367   : > { %v1885_v27 = vadd.f32 %v1879_v25, %v1773_v20  ;;  %v2810_v28 = vpop.f32.mrb[25].mxu0 }
 0x368   : > { %v1882_v29 = vpop.f32.mrb[26].mxu0 }
 0x369   : > { %v1893_v30 = vadd.f32 %v2411_v26, %v1885_v27  ;;  %v2811_v31 = vpop.f32.mrb[27].mxu0 }
 0x36b   : > { %v1894_v32 = vmax.f32 %v1893_v30, 0.0 }
 0x36d   : > { %v1895_v33 = vpack.c.bf16 %v1894_v32, %v1894_v32 }
 0x36f   : > { %v1903_v34 = vsel %vm1901_vm1, %v1895_v33, 0 }
 0x370   : > { %2813 = vmatpush3.bf16.msra.mxu1 %v1903_v34 }
 0x371   : > { %2818 = vmatprep.subr.bf16.mxu1 %v3060_v1 }
 0x373   : > { %2815 = vmatmul.mubr.msk.bf16.vlgmr.msra.gmra.mrb[24].mxu1 %vm1897_vm2, %v1896_v35 }
 0x374   : > { %2819 = vmatpush3.bf16.msra.mxu1 %v2988_v36  ;;  %2834 = vmatprep.mubr.msk.bf16.mxu1 %vm3061_vm0, %v3060_v1 }
 0x375   : > { %2820 = vmatprep.subr.bf16.mxu1 %v3060_v1 }
 0x378   : > { %2821 = vmatpush3.bf16.msra.mxu1 %v2989_v37 }
 0x379   : > { %2822 = vmatprep.subr.bf16.mxu1 %v3060_v1 }
 0x37c   : > { %2823 = vmatpush3.bf16.msra.mxu1 %v2990_v38 }
 0x37d   : > { %2824 = vmatprep.subr.bf16.mxu1 %v3060_v1 }
 0x380   : > { %2825 = vmatpush3.bf16.msra.mxu1 %v2991_v39 }
 0x381   : > { %2826 = vmatprep.subr.bf16.mxu1 %v3060_v1 }
 0x384   : > { %2827 = vmatpush3.bf16.msra.mxu1 %v2992_v40 }
 0x385   : > { %2828 = vmatprep.subr.bf16.mxu1 %v3060_v1 }
 0x388   : > { %2829 = vmatpush3.bf16.msra.mxu1 %v2993_v41 }
 0x389   : > { %2830 = vmatprep.subr.bf16.mxu1 %v3060_v1 }
 0x38c   : > { %2831 = vmatpush3.bf16.msra.mxu1 %v2994_v42 }
 0x38d   : > { %2832 = vmatprep.subr.bf16.mxu1 %v3060_v1 }
 0x390   : > { %2833 = vmatpush3.bf16.msra.mxu1 %v2995_v43 }
 0x446   : > { %v1939_v44 = vpop.f32.mrb[24].mxu1 }
 0x447   : > { %v1945_v45 = vpack.c.bf16 %v1939_v44, %v1939_v44  ;;  %v2816_v46 = vpop.f32.mrb[25].mxu1 }
 0x448   : > { %v1942_v47 = vpop.f32.mrb[26].mxu1 }
 0x449   : > { %v2817_v48 = vpop.f32.mrb[27].mxu1  ;;  %2835 = vmatmul.mubr.bf16.vlgmr.msra.gmra.mrb[28].mxu1 %v1945_v45 }
 0x51c   : > { %v2045_v1 = vpop.f32.mrb[28].mxu1 }
 0x51d   : > { %v2046_v50 = vadd.f32 %v2045_v1, %v1962_v49  ;;  %v2836_v51 = vpop.f32.mrb[29].mxu1 }
 0x51e   : > { %v2048_v52 = vpop.f32.mrb[30].mxu1 }
 0x51f   : > { %2051 = vst [vmem:[%s395_s29] sm:$0x1] %v2046_v50  ;;  %v2837_v53 = vpop.f32.mrb[31].mxu1 }
 0x520   : > { %3009 = shalt.err (!%p3006_p3)
}
 0x521   : > { %s3010_s22 = scalar_lea.hbm %s3694_s13, 16  ;;  %s3014_s30 = scalar_lea.hbm %s3747_s11, 32 }
 0x522   : > { %p3011_p4 = scmp.ne.s32.totalorder %s3694_s13, %s3010_s22  ;;  %p3015_p9 = scmp.lt.u32.totalorder %s3694_s13, %s3747_s11 }
 0x523   : > { %p3016_p10 = scmp.lt.u32.totalorder %s3014_s30, %s3010_s22  ;;  %p3018_p12 = scmp.lt.u32.totalorder %s3010_s22, %s3694_s13 }
 0x524   : > { %p3012_p7 = pnand %p3011_p4, %p3161_p5 }
 0x525   : > { %p3017_p11 = por %p3016_p10, %p3015_p9 }
 0x526   : > { %p3013_p8 = pneg %p3012_p7 }
 0x527   : > { %p3019_p13 = por %p3018_p12, %p3017_p11 }
 0x529   : > { %p3020_p0 = pnand %p3019_p13, %p3013_p8 }
 0x52b   : > { %3023 = shalt.err (!%p3020_p0)
}
 0x52c   : > { %2838 = dma.vmem_to_hbm [thread:$0]  (%p3161_p5), %s3696_s14, 16, %s3694_s13, %s2053_s26  }
 0x52d PF: > { %p2844_p1 = scmp.ge.s32.totalorder %s3058_s20, 2  ;;  %s2077_s21 = sand.u32 1, %s3046_s17  }
 0x52e   : > { %s2078_s24 = scalar_lea.sflag [#allocation3], %s2077_s21 }
 0x52f   : > { %p2841_p2 = pnand %p2844_p1, %p3165_p6 }
 0x531   : > { %3041 = dma.done.wait (!%p2841_p2), %s2078_s24, 16  }
 0x532   : > { %3043 = vsyncadd (!%p2841_p2), %s2078_s24, 4294967280  ;;  %s3751_s16 = sld [smem:[#allocation5_spill]]  ;;  %p21_p3 = scmp.ge.s32.totalorder %s3148_s23, 4  }
 0x533   : > { %s3752_s17 = smov %s3050_s18  ;;  %s3753_s18 = smov %s3054_s19 }
 0x534   : > { %s3755_s20 = smov %s3148_s23  ;;  %23 = sbr.rel (!%p21_p3) target bundleno = 3 (0x3), region = 112 }
 0x538   : > { %s3754_s19 = smov %s3751_s16 }
 0x53b   :  { %2082 = vsyncpa [#allocation3], 1 }
 0x53c   :  { %2084 = vsyncpa [#allocation3 + $0x1], 1 }

</bundles_post_ra>
